<compile_context>
chip_gen: v7x
topology: tpu7x:2x2x1
jax: 0.10.0
libtpu: 0.0.40
codegen_flags: <defaults>
</compile_context>

<pallas_src>
import functools

import jax
import jax.numpy as jnp
from jax.experimental import pallas as pl
from jax.experimental.pallas import tpu as pltpu


def _round_up(x: int, m: int) -> int:
    return (x + m - 1) // m * m


_TM = 512                                  # row tile for A in the tiled path
_TK = 512                                  # k-reduction tile for A
_Z_RESIDENT_MAX_BYTES = 12 * 1024 * 1024   # keep Z whole in VMEM below this


@functools.lru_cache(maxsize=None)
def _tpu_config():
    """Returns (vmem_limit_bytes, fused-path max nodes) for this chip."""
    cap = 64 * 1024 * 1024                 # conservative fallback (v7x-sized)
    try:
        cap = int(getattr(pltpu.get_tpu_info(), "vmem_capacity_bytes", cap))
    except Exception:
        pass
    vmem_limit = min(int(cap * 0.75), 100 * 1024 * 1024)
    # v7x has 64 MiB/TC and 2 TCs: the grid=(1,) fused path runs on one TC,
    # so cross over to the row-parallel tiled path earlier than on v5e/v6e.
    fuse_max_nodes = 1536 if cap <= 80 * 1024 * 1024 else 3072
    return vmem_limit, fuse_max_nodes


# ---------------------------------------------------------------------------
# Graph preprocessing (plain JAX): dense GCN-normalized adjacency.
# Self-loops are added only for nodes that do not already have one
# (matches PyG gcn_norm / add_remaining_self_loops; no double counting).
# ---------------------------------------------------------------------------
def build_norm_adj(edges, num_nodes):
    edges = edges.astype(jnp.int32)                 # torch .long() equivalent
    row, col = edges[0], edges[1]
    a = jnp.zeros((num_nodes, num_nodes), jnp.float32)
    a = a.at[col, row].add(1.0)                     # aggregate at target node
    diag = jnp.diagonal(a)
    a = a + jnp.diag(jnp.where(diag == 0.0, 1.0, 0.0))   # add missing loops
    deg = a.sum(axis=1)
    d_inv_sqrt = jnp.where(deg > 0, jax.lax.rsqrt(deg), 0.0)
    return d_inv_sqrt[:, None] * a * d_inv_sqrt[None, :]


# ---------------------------------------------------------------------------
# Fused small/mid-graph kernel: all layers in one pallas_call, A_hat resident.
# Padded node rows pick up relu(b) garbage, but padded A_hat columns are zero
# so it never leaks into real rows; the wrapper slices it off.
# ---------------------------------------------------------------------------
def _fused_gcn_kernel(*refs, num_layers):
    a_ref, x_ref = refs[0], refs[1]
    w_refs = refs[2:2 + num_layers]
    b_refs = refs[2 + num_layers:2 + 2 * num_layers]
    o_ref = refs[2 + 2 * num_layers]

    a = a_ref[...]                                   # bf16 [N, N]
    h = x_ref[...]                                   # bf16 [N, F0]
    for l in range(num_layers):
        z = jnp.dot(h, w_refs[l][...], preferred_element_type=jnp.float32)
        out = jnp.dot(a, z.astype(jnp.bfloat16),
                      preferred_element_type=jnp.float32)
        out = out + b_refs[l][...]                   # bias in f32
        if l + 1 < num_layers:
            h = jnp.maximum(out, 0.0).astype(jnp.bfloat16)
        else:
            o_ref[...] = out.astype(o_ref.dtype)


def _fused_forward(a_pad, x_pad, w_pads, b_pads, *, vmem_limit):
    n_pad = a_pad.shape[0]
    num_layers = len(w_pads)
    f_last_pad = w_pads[-1].shape[1]
    in_specs = [pl.BlockSpec(a_pad.shape, lambda i: (0, 0)),
                pl.BlockSpec(x_pad.shape, lambda i: (0, 0))]
    for w in w_pads:
        in_specs.append(pl.BlockSpec(w.shape, lambda i: (0, 0)))
    for b in b_pads:
        in_specs.append(pl.BlockSpec(b.shape, lambda i: (0, 0)))
    kernel = functools.partial(_fused_gcn_kernel, num_layers=num_layers)
    return pl.pallas_call(
        kernel,
        out_shape=jax.ShapeDtypeStruct((n_pad, f_last_pad), jnp.float32),
        grid=(1,),
        in_specs=in_specs,
        out_specs=pl.BlockSpec((n_pad, f_last_pad), lambda i: (0, 0)),
        compiler_params=pltpu.CompilerParams(
            dimension_semantics=("arbitrary",),
            vmem_limit_bytes=vmem_limit),
    )(a_pad, x_pad, *w_pads, *b_pads)


# ---------------------------------------------------------------------------
# Tiled large-graph path.
#   (1) Z0 = X @ W0 : row-tiled, W kept as one small resident block.
#   (2) per layer l: out = A_hat @ Z_l + b_l [+ReLU] [@ W_{l+1}]:
#       tiled over (rows, k-reduction) with an f32 VMEM accumulator; Z kept
#       fully VMEM-resident when it fits (constant index_map + pl.ds slicing);
#       bias/ReLU and the next layer's XW applied only in the last-k finalize,
#       so intermediate activations never round-trip to HBM.
# ---------------------------------------------------------------------------
def _xw_kernel(x_ref, w_ref, o_ref):
    o_ref[...] = jnp.dot(x_ref[...], w_ref[...],
                         preferred_element_type=jnp.float32).astype(o_ref.dtype)


def _xw_matmul(x, w, *, tm, vmem_limit):
    n, f_in = x.shape
    f_out = w.shape[1]
    return pl.pallas_call(
        _xw_kernel,
        out_shape=jax.ShapeDtypeStruct((n, f_out), jnp.bfloat16),
        grid=(n // tm,),
        in_specs=[pl.BlockSpec((tm, f_in), lambda i: (i, 0)),
                  pl.BlockSpec((f_in, f_out), lambda i: (0, 0))],
        out_specs=pl.BlockSpec((tm, f_out), lambda i: (i, 0)),
        compiler_params=pltpu.CompilerParams(
            dimension_semantics=("parallel",),
            vmem_limit_bytes=vmem_limit),
    )(x, w)


def _agg_kernel(a_ref, z_ref, b_ref, *rest, tk, z_resident, apply_relu,
                has_w_next):
    if has_w_next:
        w_ref, o_ref, acc_ref = rest
    else:
        w_ref = None
        o_ref, acc_ref = rest
    k = pl.program_id(1)

    @pl.when(k == 0)
    def _():
        acc_ref[...] = jnp.zeros_like(acc_ref)

    if z_resident:
        off = pl.multiple_of(k * tk, tk)
        zk = z_ref[pl.ds(off, tk), :]          # slice resident Z, no re-stream
    else:
        zk = z_ref[...]
    acc_ref[...] += jnp.dot(a_ref[...], zk, preferred_element_type=jnp.float32)

    @pl.when(k == pl.num_programs(1) - 1)
    def _():
        out = acc_ref[...] + b_ref[...]
        if apply_relu:
            out = jnp.maximum(out, 0.0)
        if has_w_next:                         # fuse next layer's X @ W here
            out = jnp.dot(out.astype(jnp.bfloat16), w_ref[...],
                          preferred_element_type=jnp.float32)
        o_ref[...] = out.astype(o_ref.dtype)


def _agg_matmul(a, z, b, w_next, *, apply_relu, out_dtype, tm, tk, vmem_limit):
    n_pad = a.shape[0]
    f_out = z.shape[1]
    z_resident = z.size * z.dtype.itemsize <= _Z_RESIDENT_MAX_BYTES

    in_specs = [pl.BlockSpec((tm, tk), lambda i, k: (i, k))]
    if z_resident:
        in_specs.append(pl.BlockSpec((n_pad, f_out), lambda i, k: (0, 0)))
    else:
        in_specs.append(pl.BlockSpec((tk, f_out), lambda i, k: (k, 0)))
    in_specs.append(pl.BlockSpec((1, f_out), lambda i, k: (0, 0)))

    args = [a, z, b]
    if w_next is not None:
        in_specs.append(pl.BlockSpec(w_next.shape, lambda i, k: (0, 0)))
        args.append(w_next)
        f_res = w_next.shape[1]
    else:
        f_res = f_out

    kernel = functools.partial(_agg_kernel, tk=tk, z_resident=z_resident,
                               apply_relu=apply_relu,
                               has_w_next=w_next is not None)
    return pl.pallas_call(
        kernel,
        out_shape=jax.ShapeDtypeStruct((n_pad, f_res), out_dtype),
        grid=(n_pad // tm, n_pad // tk),              # reduction axis last
        in_specs=in_specs,
        out_specs=pl.BlockSpec((tm, f_res), lambda i, k: (i, 0)),
        scratch_shapes=[pltpu.VMEM((tm, f_out), jnp.float32)],
        compiler_params=pltpu.CompilerParams(
            dimension_semantics=("parallel", "arbitrary"),
            vmem_limit_bytes=vmem_limit),
    )(*args)


# ---------------------------------------------------------------------------
# MultiGCN forward.
# ---------------------------------------------------------------------------
def multi_gcn_forward(x, edges, weights, biases, *, a_hat=None,
                      force_tiled=False):
    """x: [N, F0] node features, edges: [2, E] int edge index."""
    n, f0 = x.shape
    num_layers = len(weights)
    f_last = weights[-1].shape[1]
    vmem_limit, fuse_max_nodes = _tpu_config()

    if a_hat is None:                 # can be precomputed/cached for static graphs
        a_hat = build_norm_adj(edges, n)
    f0_pad = _round_up(f0, 128)

    def pad_w(w):
        fi, fo = w.shape
        return jnp.zeros((_round_up(fi, 128), _round_up(fo, 128)),
                         jnp.bfloat16).at[:fi, :fo].set(w.astype(jnp.bfloat16))

    def pad_b(b):
        fo = b.shape[0]
        return jnp.zeros((1, _round_up(fo, 128)), jnp.float32).at[0, :fo].set(b)

    w_pads = [pad_w(w) for w in weights]
    b_pads = [pad_b(b) for b in biases]

    use_fused = (not force_tiled) and n <= fuse_max_nodes
    if use_fused:
        n_fp = _round_up(n, 16)                  # bf16 sublane multiple only
        f_max = max(f0_pad, max(w.shape[1] for w in w_pads))
        est = (2 * 2 * n_fp * n_fp               # A bf16 (double-buffered)
               + 2 * 2 * n_fp * f0_pad           # X bf16
               + sum(2 * 2 * w.size for w in w_pads)
               + 3 * 4 * n_fp * f_max            # in-kernel f32 intermediates
               + 2 * 4 * n_fp * w_pads[-1].shape[1])
        use_fused = est <= int(0.7 * vmem_limit)

    if use_fused:
        # --- fused path: one launch, A_hat read from HBM exactly once. ---
        n_pad = _round_up(n, 16)
        a_pad = jnp.zeros((n_pad, n_pad), jnp.bfloat16).at[:n, :n].set(
            a_hat.astype(jnp.bfloat16))
        x_pad = jnp.zeros((n_pad, f0_pad), jnp.bfloat16).at[:n, :f0].set(
            x.astype(jnp.bfloat16))
        out = _fused_forward(a_pad, x_pad, w_pads, b_pads,
                             vmem_limit=vmem_limit)
        return out[:n, :f_last]

    # --- tiled path: XW kernel for layer 0 only, then per-layer tiled A@Z
    #     with bias/ReLU and next-layer XW fused into the finalize.
    n_pad = _round_up(n, max(_TM, _TK))
    a_pad = jnp.zeros((n_pad, n_pad), jnp.bfloat16).at[:n, :n].set(
        a_hat.astype(jnp.bfloat16))
    x_pad = jnp.zeros((n_pad, f0_pad), jnp.bfloat16).at[:n, :f0].set(
        x.astype(jnp.bfloat16))
    z = _xw_matmul(x_pad, w_pads[0], tm=_TM, vmem_limit=vmem_limit)
    for l in range(num_layers):
        last = (l + 1 == num_layers)
        w_next = None if last else w_pads[l + 1]
        # Dropout p=0.0 is the identity, so it is omitted.
        z = _agg_matmul(a_pad, z, b_pads[l], w_next,
                        apply_relu=not last,
                        out_dtype=jnp.float32 if last else jnp.bfloat16,
                        tm=_TM, tk=_TK, vmem_limit=vmem_limit)
    return z[:n, :f_last]


# ---------------------------------------------------------------------------
# Pure-JAX f32 reference (for validation) and parameter init (glorot, zero b).
# ---------------------------------------------------------------------------
def multi_gcn_reference(x, edges, weights, biases):
    a = build_norm_adj(edges, x.shape[0])
    h = x.astype(jnp.float32)
    for i, (w, b) in enumerate(zip(weights, biases)):
        h = a @ (h @ w) + b
        if i + 1 < len(weights):
            h = jnp.maximum(h, 0.0)
    return h


def init_params(key, n_units):
    weights, biases = [], []
    wkeys = jax.random.split(key, len(n_units) - 1)
    for i in range(len(n_units) - 1):
        fan_in, fan_out = n_units[i], n_units[i + 1]
        limit = (6.0 / (fan_in + fan_out)) ** 0.5
        weights.append(jax.random.uniform(
            wkeys[i], (fan_in, fan_out), jnp.float32, minval=-limit, maxval=limit))
        biases.append(jnp.zeros((fan_out,), jnp.float32))
    return weights, biases


def _normwise_err(out, ref):
    return float(jnp.max(jnp.abs(out - ref)) / (jnp.max(jnp.abs(ref)) + 1e-6))


if __name__ == "__main__":
    key = jax.random.PRNGKey(0)
    k_x, k_w, k_e, k_x2, k_x3, k_e3 = jax.random.split(key, 6)

    n_units = [17, 128, 100]            # MultiGCN default
    weights, biases = init_params(k_w, n_units)

    # jit the whole forward so the dense scatter-add / padding preprocessing
    # fuses and is not a per-call Python-dispatch cost.
    fwd = jax.jit(multi_gcn_forward, static_argnames=("force_tiled",))

    # ---- case 1: default config, 17 joints, undirected chain (fused path) ----
    num_nodes = 17
    x = jax.random.normal(k_x, (num_nodes, n_units[0]), jnp.float32)
    src = jnp.arange(num_nodes - 1, dtype=jnp.int32)
    dst = src + 1
    edges = jnp.concatenate([jnp.stack([src, dst]), jnp.stack([dst, src])], axis=1)

    out = jax.block_until_ready(fwd(x, edges, weights, biases))
    ref = multi_gcn_reference(x, edges, weights, biases)
    assert out.shape == (num_nodes, n_units[-1]), out.shape
    assert bool(jnp.all(jnp.isfinite(out)))
    assert _normwise_err(out, ref) < 5e-2, _normwise_err(out, ref)

    # ---- case 2: 512-node random graph, now on the fused (A-once) path ----
    n2 = 512
    x2 = jax.random.normal(k_x2, (n2, n_units[0]), jnp.float32)
    e_src = jax.random.randint(k_e, (2048,), 0, n2, dtype=jnp.int32)
    e_dst = jax.random.randint(jax.random.fold_in(k_e, 1), (2048,), 0, n2,
                               dtype=jnp.int32)
    edges2 = jnp.stack([e_src, e_dst])
    out2 = jax.block_until_ready(fwd(x2, edges2, weights, biases))
    ref2 = multi_gcn_reference(x2, edges2, weights, biases)
    assert out2.shape == (n2, n_units[-1]), out2.shape
    assert bool(jnp.all(jnp.isfinite(out2)))
    assert _normwise_err(out2, ref2) < 5e-2, _normwise_err(out2, ref2)

    # ---- case 3: force the tiled path (Z-resident agg + fused-XW finalize) ----
    n3 = 1000
    x3 = jax.random.normal(k_x3, (n3, n_units[0]), jnp.float32)
    e3_src = jax.random.randint(k_e3, (4096,), 0, n3, dtype=jnp.int32)
    e3_dst = jax.random.randint(jax.random.fold_in(k_e3, 1), (4096,), 0, n3,
                                dtype=jnp.int32)
    edges3 = jnp.stack([e3_src, e3_dst])
    out3 = jax.block_until_ready(fwd(x3, edges3, weights, biases,
                                     force_tiled=True))
    ref3 = multi_gcn_reference(x3, edges3, weights, biases)
    assert out3.shape == (n3, n_units[-1]), out3.shape
    assert bool(jnp.all(jnp.isfinite(out3)))
    assert _normwise_err(out3, ref3) < 5e-2, _normwise_err(out3, ref3)

    print("KERNEL_OK")
</pallas_src>

<mosaic_0001>
module attributes {stable_mosaic.version = 11 : i64} {
  func.func private @main(%arg0: i32) attributes {dimension_semantics = [#tpu.dimension_semantics<core_parallel>], iteration_bounds = array<i64: 2>, tpu.core_type = #tpu.core_type<sc_scalar_subcore>, window_params = []} {
    return
  }
}

module attributes {stable_mosaic.version = 11 : i64} {
  func.func private @main(%arg0: i32) attributes {dimension_semantics = [#tpu.dimension_semantics<core_parallel>], iteration_bounds = array<i64: 2>, tpu.core_type = #tpu.core_type<sc_scalar_subcore>, window_params = []} {
    return
  }
}

module attributes {stable_mosaic.version = 11 : i64} {
  func.func @_fused_gcn_kernel(%arg0: i32, %arg1: memref<32x32xbf16, #tpu.memory_space<vmem>>, %arg2: memref<32x128xbf16, #tpu.memory_space<vmem>>, %arg3: memref<128x128xbf16, #tpu.memory_space<vmem>>, %arg4: memref<128x128xbf16, #tpu.memory_space<vmem>>, %arg5: memref<1x128xf32, #tpu.memory_space<vmem>>, %arg6: memref<1x128xf32, #tpu.memory_space<vmem>>, %arg7: memref<32x128xf32, #tpu.memory_space<vmem>>) attributes {dimension_semantics = [#tpu.dimension_semantics<arbitrary>], iteration_bounds = array<i64: 1>, scalar_prefetch = 0 : i64, scratch_operands = 0 : i64, tpu.core_type = #tpu.core_type<tc>, window_params = [{pipeline_mode = #tpu.pipeline_mode<synchronous>, transform_indices = @transform_0, window_bounds = array<i64: 32, 32>}, {pipeline_mode = #tpu.pipeline_mode<synchronous>, transform_indices = @transform_1, window_bounds = array<i64: 32, 128>}, {pipeline_mode = #tpu.pipeline_mode<synchronous>, transform_indices = @transform_2, window_bounds = array<i64: 128, 128>}, {pipeline_mode = #tpu.pipeline_mode<synchronous>, transform_indices = @transform_3, window_bounds = array<i64: 128, 128>}, {pipeline_mode = #tpu.pipeline_mode<synchronous>, transform_indices = @transform_4, window_bounds = array<i64: 1, 128>}, {pipeline_mode = #tpu.pipeline_mode<synchronous>, transform_indices = @transform_5, window_bounds = array<i64: 1, 128>}, {pipeline_mode = #tpu.pipeline_mode<synchronous>, transform_indices = @transform_6, window_bounds = array<i64: 32, 128>}]} {
    %c0 = arith.constant 0 : index
    %c0_0 = arith.constant 0 : index
    %0 = vector.load %arg1[%c0, %c0_0] : memref<32x32xbf16, #tpu.memory_space<vmem>>, vector<32x32xbf16>
    %c0_1 = arith.constant 0 : index
    %c0_2 = arith.constant 0 : index
    %1 = vector.load %arg2[%c0_1, %c0_2] : memref<32x128xbf16, #tpu.memory_space<vmem>>, vector<32x128xbf16>
    %c0_3 = arith.constant 0 : index
    %c0_4 = arith.constant 0 : index
    %2 = vector.load %arg3[%c0_3, %c0_4] : memref<128x128xbf16, #tpu.memory_space<vmem>>, vector<128x128xbf16>
    %cst = arith.constant dense<0.000000e+00> : vector<32x128xf32>
    %3 = tpu.matmul %1, %2, %cst {dimension_numbers = #tpu.dot_dimension_numbers<[1], [0], [0], [1], [0, 0, 1, 1], [], []>} : vector<32x128xbf16>, vector<128x128xbf16>, vector<32x128xf32> -> vector<32x128xf32>
    %4 = arith.truncf %3 : vector<32x128xf32> to vector<32x128xbf16>
    %cst_5 = arith.constant dense<0.000000e+00> : vector<32x128xf32>
    %5 = tpu.matmul %0, %4, %cst_5 {dimension_numbers = #tpu.dot_dimension_numbers<[1], [0], [0], [1], [0, 0, 1, 1], [], []>} : vector<32x32xbf16>, vector<32x128xbf16>, vector<32x128xf32> -> vector<32x128xf32>
    %c0_6 = arith.constant 0 : index
    %c0_7 = arith.constant 0 : index
    %6 = vector.load %arg5[%c0_6, %c0_7] : memref<1x128xf32, #tpu.memory_space<vmem>>, vector<1x128xf32>
    %7 = vector.broadcast %6 : vector<1x128xf32> to vector<32x128xf32>
    %8 = arith.addf %5, %7 : vector<32x128xf32>
    %cst_8 = arith.constant 0.000000e+00 : f32
    %9 = vector.broadcast %cst_8 : f32 to vector<32x128xf32>
    %10 = arith.maximumf %8, %9 : vector<32x128xf32>
    %11 = arith.truncf %10 : vector<32x128xf32> to vector<32x128xbf16>
    %c0_9 = arith.constant 0 : index
    %c0_10 = arith.constant 0 : index
    %12 = vector.load %arg4[%c0_9, %c0_10] : memref<128x128xbf16, #tpu.memory_space<vmem>>, vector<128x128xbf16>
    %cst_11 = arith.constant dense<0.000000e+00> : vector<32x128xf32>
    %13 = tpu.matmul %11, %12, %cst_11 {dimension_numbers = #tpu.dot_dimension_numbers<[1], [0], [0], [1], [0, 0, 1, 1], [], []>} : vector<32x128xbf16>, vector<128x128xbf16>, vector<32x128xf32> -> vector<32x128xf32>
    %14 = arith.truncf %13 : vector<32x128xf32> to vector<32x128xbf16>
    %cst_12 = arith.constant dense<0.000000e+00> : vector<32x128xf32>
    %15 = tpu.matmul %0, %14, %cst_12 {dimension_numbers = #tpu.dot_dimension_numbers<[1], [0], [0], [1], [0, 0, 1, 1], [], []>} : vector<32x32xbf16>, vector<32x128xbf16>, vector<32x128xf32> -> vector<32x128xf32>
    %c0_13 = arith.constant 0 : index
    %c0_14 = arith.constant 0 : index
    %16 = vector.load %arg6[%c0_13, %c0_14] : memref<1x128xf32, #tpu.memory_space<vmem>>, vector<1x128xf32>
    %17 = vector.broadcast %16 : vector<1x128xf32> to vector<32x128xf32>
    %18 = arith.addf %15, %17 : vector<32x128xf32>
    %c0_15 = arith.constant 0 : index
    %c0_16 = arith.constant 0 : index
    %19 = vector.load %arg7[%c0_15, %c0_16] : memref<32x128xf32, #tpu.memory_space<vmem>>, vector<32x128xf32>
    tpu.vector_store %arg7[%c0_15, %c0_16], %18 {strides = array<i32>} : memref<32x128xf32, #tpu.memory_space<vmem>>, vector<32x128xf32>,
    return
  }
  func.func @transform_0(%arg0: i32) -> (i32, i32) {
    %c0_i32 = arith.constant 0 : i32
    %c0_i32_0 = arith.constant 0 : i32
    %c0_i32_1 = arith.constant 0 : i32
    return %c0_i32, %c0_i32_0 : i32, i32
  }
  func.func @transform_1(%arg0: i32) -> (i32, i32) {
    %c0_i32 = arith.constant 0 : i32
    %c0_i32_0 = arith.constant 0 : i32
    %c0_i32_1 = arith.constant 0 : i32
    return %c0_i32, %c0_i32_0 : i32, i32
  }
  func.func @transform_2(%arg0: i32) -> (i32, i32) {
    %c0_i32 = arith.constant 0 : i32
    %c0_i32_0 = arith.constant 0 : i32
    %c0_i32_1 = arith.constant 0 : i32
    return %c0_i32, %c0_i32_0 : i32, i32
  }
  func.func @transform_3(%arg0: i32) -> (i32, i32) {
    %c0_i32 = arith.constant 0 : i32
    %c0_i32_0 = arith.constant 0 : i32
    %c0_i32_1 = arith.constant 0 : i32
    return %c0_i32, %c0_i32_0 : i32, i32
  }
  func.func @transform_4(%arg0: i32) -> (i32, i32) {
    %c0_i32 = arith.constant 0 : i32
    %c0_i32_0 = arith.constant 0 : i32
    %c0_i32_1 = arith.constant 0 : i32
    return %c0_i32, %c0_i32_0 : i32, i32
  }
  func.func @transform_5(%arg0: i32) -> (i32, i32) {
    %c0_i32 = arith.constant 0 : i32
    %c0_i32_0 = arith.constant 0 : i32
    %c0_i32_1 = arith.constant 0 : i32
    return %c0_i32, %c0_i32_0 : i32, i32
  }
  func.func @transform_6(%arg0: i32) -> (i32, i32) {
    %c0_i32 = arith.constant 0 : i32
    %c0_i32_0 = arith.constant 0 : i32
    %c0_i32_1 = arith.constant 0 : i32
    return %c0_i32, %c0_i32_0 : i32, i32
  }
}

</mosaic_0001>

<bundles_post_ra>
// kernel: multi_gcn_forward.1
= control target key start
LH: loop header
LB: loop body
LE: loop exit
PB: predicated region body
PF: predicated region fallthrough
CT: control target
= control target key end

     0   :  { %vm176_vm0 = vcmask 261120   ;;  %s664_s2 = inlined_call_operand.vmem [shape: bf16[128,128], index: 2, kind: input, shape index: {}]   ;;  %s665_s1 = inlined_call_operand.vmem [shape: bf16[32,128], index: 1, kind: input, shape index: {}]   ;;  %s666_s0 = inlined_call_operand.vmem [shape: bf16[32,32], index: 0, kind: input, shape index: {}]   ;;  %s667_s3 = inlined_call_operand.vmem [shape: bf16[128,128], index: 3, kind: input, shape index: {}]   ;;  %s668_s4 = inlined_call_operand.vmem [shape: f32[1,128], index: 4, kind: input, shape index: {}]   ;;  %s669_s5 = inlined_call_operand.vmem [shape: f32[1,128], index: 5, kind: input, shape index: {}]   ;;  %s670_s6 = inlined_call_operand.vmem [shape: f32[32,128], index: 6, kind: output, shape index: {}]  }
   0x1   :  { %v527_v0 = vld [vmem:[%s664_s2] sm:$0xff]   ;;  %v528_v1 = vld [vmem:[%s664_s2 + $0x8] sm:$0xff]   ;;  %v529_v2 = vld [vmem:[%s664_s2 + $0x10] sm:$0xff]  }
   0x2   :  { %471 = vmatprep.subr.bf16.mxu0 %v527_v0  ;;  %v530_v3 = vld [vmem:[%s664_s2 + $0x18] sm:$0xff]   ;;  %v535_v4 = vld [vmem:[%s665_s1] sm:$0xff]   ;;  %v532_v6 = vld [vmem:[%s664_s2 + $0x28] sm:$0xff]  }
   0x3   :  { %472 = vmatpush3.bf16.msra.mxu0 %v527_v0  ;;  %487 = vmatprep.mubr.bf16.mxu0 %v535_v4  ;;  %v531_v5 = vld [vmem:[%s664_s2 + $0x20] sm:$0xff]   ;;  %v533_v7 = vld [vmem:[%s664_s2 + $0x30] sm:$0xff]   ;;  %v534_v8 = vld [vmem:[%s664_s2 + $0x38] sm:$0xff]  }
   0x4   :  { %473 = vmatprep.subr.bf16.mxu0 %v528_v1  ;;  %v536_v9 = vld [vmem:[%s665_s1 + $0x8] sm:$0xff]   ;;  %v537_v10 = vld [vmem:[%s666_s0] sm:$0xff]   ;;  %v541_v20 = vld [vmem:[%s667_s3 + $0x10] sm:$0xff]  }
   0x5   :  { %495 = vmatprep.mubr.msk.bf16.mxu1 %vm176_vm0, %v537_v10  ;;  %v539_v17 = vld [vmem:[%s667_s3] sm:$0xff]   ;;  %v538_v18 = vld [vmem:[%s666_s0 + $0x8] sm:$0xff]   ;;  %v542_v21 = vld [vmem:[%s667_s3 + $0x18] sm:$0xff]  }
   0x6   :  { %v540_v19 = vld [vmem:[%s667_s3 + $0x8] sm:$0xff]   ;;  %v543_v22 = vld [vmem:[%s667_s3 + $0x20] sm:$0xff]   ;;  %v545_v24 = vld [vmem:[%s667_s3 + $0x30] sm:$0xff]  }
   0x7   :  { %474 = vmatpush3.bf16.msra.mxu0 %v528_v1  ;;  %v544_v23 = vld [vmem:[%s667_s3 + $0x28] sm:$0xff]   ;;  %v546_v25 = vld [vmem:[%s667_s3 + $0x38] sm:$0xff]   ;;  %v427_v26 = vld [vmem:[%s668_s4] ss:$0 sm:$0xff] }
   0x8   :  { %475 = vmatprep.subr.bf16.mxu0 %v529_v2  ;;  %v440_v47 = vld [vmem:[%s669_s5] ss:$0 sm:$0xff] }
   0xb   :  { %476 = vmatpush3.bf16.msra.mxu0 %v529_v2 }
   0xc   :  { %477 = vmatprep.subr.bf16.mxu0 %v530_v3 }
   0xf   :  { %478 = vmatpush3.bf16.msra.mxu0 %v530_v3 }
  0x10   :  { %479 = vmatprep.subr.bf16.mxu0 %v531_v5 }
  0x13   :  { %480 = vmatpush3.bf16.msra.mxu0 %v531_v5 }
  0x14   :  { %481 = vmatprep.subr.bf16.mxu0 %v532_v6 }
  0x17   :  { %482 = vmatpush3.bf16.msra.mxu0 %v532_v6 }
  0x18   :  { %483 = vmatprep.subr.bf16.mxu0 %v533_v7 }
  0x1b   :  { %484 = vmatpush3.bf16.msra.mxu0 %v533_v7 }
  0x1c   :  { %485 = vmatprep.subr.bf16.mxu0 %v534_v8 }
  0x1f   :  { %486 = vmatpush3.bf16.msra.mxu0 %v534_v8 }
  0x22   :  { %488 = vmatmul.mubr.bf16.vlgmr.msra.gmra.mrb[0].mxu0 %v536_v9 }
  0x23   :  { %523 = vmatprep.mubr.msk.bf16.mxu0 %vm176_vm0, %v537_v10 }
  0xf5   :  { %v489_v11 = vpop.f32.mrb[0].mxu0 }
  0xf6   :  { %v142_v12 = vpop.f32.mrb[1].mxu0 }
  0xf7   :  { %v490_v13 = vpop.f32.mrb[2].mxu0 }
  0xf8   :  { %v158_v14 = vpack.c.bf16 %v490_v13, %v489_v11  ;;  %v145_v15 = vpop.f32.mrb[3].mxu0 }
  0xf9   :  { %v157_v16 = vpack.c.bf16 %v145_v15, %v142_v12 }
  0xfb   :  { %491 = vmatprep.subr.bf16.mxu1 %v157_v16 }
  0xfc   :  { %492 = vmatpush3.bf16.msra.mxu1 %v157_v16 }
  0xfd   :  { %493 = vmatprep.subr.bf16.mxu1 %v158_v14 }
 0x100   :  { %494 = vmatpush3.bf16.msra.mxu1 %v158_v14 }
 0x101   :  { %499 = vmatprep.subr.bf16.mxu1 %v539_v17 }
 0x103   :  { %496 = vmatmul.mubr.msk.bf16.vlgmr.msra.gmra.mrb[0].mxu1 %vm176_vm0, %v538_v18 }
 0x104   :  { %500 = vmatpush3.bf16.msra.mxu1 %v539_v17 }
 0x105   :  { %501 = vmatprep.subr.bf16.mxu1 %v540_v19 }
 0x108   :  { %502 = vmatpush3.bf16.msra.mxu1 %v540_v19 }
 0x109   :  { %503 = vmatprep.subr.bf16.mxu1 %v541_v20 }
 0x10c   :  { %504 = vmatpush3.bf16.msra.mxu1 %v541_v20 }
 0x10d   :  { %505 = vmatprep.subr.bf16.mxu1 %v542_v21 }
 0x110   :  { %506 = vmatpush3.bf16.msra.mxu1 %v542_v21 }
 0x111   :  { %507 = vmatprep.subr.bf16.mxu1 %v543_v22 }
 0x114   :  { %508 = vmatpush3.bf16.msra.mxu1 %v543_v22 }
 0x115   :  { %509 = vmatprep.subr.bf16.mxu1 %v544_v23 }
 0x118   :  { %510 = vmatpush3.bf16.msra.mxu1 %v544_v23 }
 0x119   :  { %511 = vmatprep.subr.bf16.mxu1 %v545_v24 }
 0x11c   :  { %512 = vmatpush3.bf16.msra.mxu1 %v545_v24 }
 0x11d   :  { %513 = vmatprep.subr.bf16.mxu1 %v546_v25 }
 0x120   :  { %514 = vmatpush3.bf16.msra.mxu1 %v546_v25 }
 0x1d6   :  { %v497_v27 = vpop.f32.mrb[0].mxu1 }
 0x1d7   :  { %v226_v28 = vadd.f32 %v497_v27, %v427_v26  ;;  %v217_v29 = vpop.f32.mrb[1].mxu1 }
 0x1d8   :  { %v218_v30 = vadd.f32 %v427_v26, %v217_v29  ;;  %v498_v31 = vpop.f32.mrb[2].mxu1 }
 0x1d9   :  { %v229_v32 = vadd.f32 %v498_v31, %v427_v26  ;;  %v220_v33 = vpop.f32.mrb[3].mxu1  ;;  %v234_v35 = vmax.f32 %v226_v28, 0.0 }
 0x1da   :  { %v221_v34 = vadd.f32 %v427_v26, %v220_v33  ;;  %v232_v37 = vmax.f32 %v218_v30, 0.0 }
 0x1db   :  { %v235_v36 = vmax.f32 %v229_v32, 0.0 }
 0x1dc   :  { %v233_v38 = vmax.f32 %v221_v34, 0.0 }
 0x1dd   :  { %v237_v39 = vpack.c.bf16 %v235_v36, %v234_v35 }
 0x1de   :  { %v236_v40 = vpack.c.bf16 %v233_v38, %v232_v37 }
 0x1e0   :  { %515 = vmatprep.mubr.bf16.mxu1 %v236_v40 }
 0x1e1   :  { %516 = vmatmul.mubr.bf16.vlgmr.msra.gmra.mrb[4].mxu1 %v237_v39 }
 0x2b4   :  { %v517_v41 = vpop.f32.mrb[4].mxu1 }
 0x2b5   :  { %v336_v42 = vpop.f32.mrb[5].mxu1 }
 0x2b6   :  { %v518_v43 = vpop.f32.mrb[6].mxu1 }
 0x2b7   :  { %v352_v44 = vpack.c.bf16 %v518_v43, %v517_v41  ;;  %v339_v45 = vpop.f32.mrb[7].mxu1 }
 0x2b8   :  { %v351_v46 = vpack.c.bf16 %v339_v45, %v336_v42 }
 0x2ba   :  { %519 = vmatprep.subr.bf16.mxu0 %v351_v46 }
 0x2bb   :  { %520 = vmatpush3.bf16.msra.mxu0 %v351_v46 }
 0x2bc   :  { %521 = vmatprep.subr.bf16.mxu0 %v352_v44 }
 0x2bf   :  { %522 = vmatpush3.bf16.msra.mxu0 %v352_v44 }
 0x2c2   :  { %524 = vmatmul.mubr.msk.bf16.vlgmr.msra.gmra.mrb[4].mxu0 %vm176_vm0, %v538_v18 }
 0x395   :  { %v525_v48 = vpop.f32.mrb[4].mxu0 }
 0x396   :  { %v403_v49 = vadd.f32 %v525_v48, %v440_v47  ;;  %v394_v50 = vpop.f32.mrb[5].mxu0 }
 0x397   :  { %v395_v51 = vadd.f32 %v440_v47, %v394_v50  ;;  %v526_v52 = vpop.f32.mrb[6].mxu0 }
 0x398   :  { %411 = vst [vmem:[%s670_s6 + $0x10] sm:$0xff] %v403_v49  ;;  %v406_v53 = vadd.f32 %v526_v52, %v440_v47  ;;  %v397_v54 = vpop.f32.mrb[7].mxu0 }
 0x399   :  { %409 = vst [vmem:[%s670_s6] sm:$0xff] %v395_v51  ;;  %v398_v55 = vadd.f32 %v440_v47, %v397_v54 }
 0x39a   :  { %412 = vst [vmem:[%s670_s6 + $0x18] sm:$0xff] %v406_v53 }
 0x39b   :  { %410 = vst [vmem:[%s670_s6 + $0x8] sm:$0xff] %v398_v55 }

</bundles_post_ra>
